<compile_context>
chip_gen: v7x
topology: tpu7x:2x2x1
jax: 0.10.0
libtpu: 0.0.40
codegen_flags: <defaults>
</compile_context>

<pallas_src>
import jax
import jax.numpy as jnp
from jax.experimental import pallas as pl
from jax.experimental.pallas import tpu as pltpu

IN_DIM = 768
HID_DIM = 512
OUT_DIM = 3
OUT_PAD = 128            # lane-dense padded fc2 output width
DEFAULT_TILE_B = 1024    # amortizes per-grid-step pipeline overhead


def _round_up(x, m):
    return ((x + m - 1) // m) * m


def _nli_mlp_kernel(x_ref, w1_ref, b1_ref, w2_ref, b2_ref, o_ref):
    # x tile arrives f32 (single HBM stream); cast to bf16 in VMEM for the MXU.
    x_bf = x_ref[...].astype(jnp.bfloat16)
    # fc1: [TB, 768] bf16 @ [768, 512] bf16 -> f32 accumulate on MXU
    h = jnp.dot(x_bf, w1_ref[...], preferred_element_type=jnp.float32)
    h = jnp.maximum(h + b1_ref[...], 0.0)            # bias + ReLU in f32
    # fc2: [TB, 512] bf16 @ [512, 128] bf16 (zero-padded cols) -> f32
    out = jnp.dot(h.astype(jnp.bfloat16), w2_ref[...],
                  preferred_element_type=jnp.float32)
    # lane-dense bf16 store (full vst); wrapper slices [:, :3] and upcasts.
    o_ref[...] = (out + b2_ref[...]).astype(o_ref.dtype)


def prepare_params(w1_t, b1, w2_t, b2):
    """One-time param prep (hoisted out of the per-call forward).

    w1_t: [768, 512], b1: [1, 512] or [512], w2_t: [512, 3], b2: [1, 3] or [3].
    Returns (w1 bf16, b1 f32 [1,512], w2 bf16 [512,128] zero-padded,
             b2 f32 [1,128] zero-padded).
    """
    w1_bf = w1_t.astype(jnp.bfloat16)
    b1_f32 = jnp.asarray(b1, jnp.float32).reshape(1, HID_DIM)
    w2_pad = jnp.pad(w2_t, ((0, 0), (0, OUT_PAD - OUT_DIM))).astype(jnp.bfloat16)
    b2_pad = jnp.pad(jnp.asarray(b2, jnp.float32).reshape(1, OUT_DIM),
                     ((0, 0), (0, OUT_PAD - OUT_DIM)))
    return (w1_bf, b1_f32, w2_pad, b2_pad)


def nli_classifier_forward(x, prepped_params, *, tile_b=DEFAULT_TILE_B):
    """x: [B, 768] f32; prepped_params from prepare_params(). Returns [B, 3] f32."""
    w1_bf, b1_f32, w2_pad, b2_pad = prepped_params
    B = x.shape[0]

    # Batch tile: multiple of 8 sublanes, capped at tile_b, and sized so the
    # grid has >= 2 steps whenever B is big enough (both v7x TCs busy;
    # harmless on single-TC v5e/v6e).
    tb = min(tile_b, max(8, _round_up(pl.cdiv(B, 2), 8)))
    n_tiles = pl.cdiv(B, tb)
    # No batch padding: Pallas partial edge blocks drop OOB writes, and every
    # output row depends only on its own input row (no cross-row reduction).

    flops = 2 * B * (IN_DIM * HID_DIM + HID_DIM * OUT_PAD)
    bytes_accessed = (
        B * IN_DIM * 4                          # x (f32, read once)
        + IN_DIM * HID_DIM * 2 + HID_DIM * 4    # W1 (bf16) + b1 (f32)
        + HID_DIM * OUT_PAD * 2 + OUT_PAD * 4   # W2 (bf16) + b2 (f32)
        + B * OUT_PAD * 2                       # output (bf16)
    )

    out = pl.pallas_call(
        _nli_mlp_kernel,
        out_shape=jax.ShapeDtypeStruct((B, OUT_PAD), jnp.bfloat16),
        grid_spec=pltpu.PrefetchScalarGridSpec(
            num_scalar_prefetch=0,
            grid=(n_tiles,),
            in_specs=[
                pl.BlockSpec((tb, IN_DIM), lambda i: (i, 0)),        # x tile (f32)
                pl.BlockSpec((IN_DIM, HID_DIM), lambda i: (0, 0)),   # W1 resident
                pl.BlockSpec((1, HID_DIM), lambda i: (0, 0)),        # b1 resident
                pl.BlockSpec((HID_DIM, OUT_PAD), lambda i: (0, 0)),  # W2 resident
                pl.BlockSpec((1, OUT_PAD), lambda i: (0, 0)),        # b2 resident
            ],
            out_specs=pl.BlockSpec((tb, OUT_PAD), lambda i: (i, 0)),
        ),
        compiler_params=pltpu.CompilerParams(
            dimension_semantics=("parallel",),        # independent batch tiles
            vmem_limit_bytes=32 * 1024 * 1024,        # TB=1024 working set ~13 MB
        ),
        cost_estimate=pl.CostEstimate(
            flops=flops, transcendentals=0, bytes_accessed=bytes_accessed),
    )(x.astype(jnp.float32), w1_bf, b1_f32, w2_pad, b2_pad)

    return out[:, :OUT_DIM].astype(jnp.float32)


def init_params(key):
    """Deterministic init matching nn.Linear shapes (stored transposed)."""
    k1, k2, k3, k4 = jax.random.split(key, 4)
    # PyTorch nn.Linear default init: U(-1/sqrt(in), 1/sqrt(in))
    lim1 = 1.0 / jnp.sqrt(jnp.float32(IN_DIM))
    lim2 = 1.0 / jnp.sqrt(jnp.float32(HID_DIM))
    w1_t = jax.random.uniform(k1, (IN_DIM, HID_DIM), jnp.float32, -lim1, lim1)
    b1 = jax.random.uniform(k2, (1, HID_DIM), jnp.float32, -lim1, lim1)
    w2_t = jax.random.uniform(k3, (HID_DIM, OUT_DIM), jnp.float32, -lim2, lim2)
    b2 = jax.random.uniform(k4, (1, OUT_DIM), jnp.float32, -lim2, lim2)
    return w1_t, b1, w2_t, b2


def _reference_bf16(x, w1_t, b1, w2_t, b2):
    """Same math as the kernel: bf16 MXU inputs, f32 accumulation, bf16 store."""
    h = jnp.dot(x.astype(jnp.bfloat16), w1_t.astype(jnp.bfloat16),
                preferred_element_type=jnp.float32) + b1
    h = jnp.maximum(h, 0.0)
    out = jnp.dot(h.astype(jnp.bfloat16), w2_t.astype(jnp.bfloat16),
                  preferred_element_type=jnp.float32) + b2
    return out.astype(jnp.bfloat16).astype(jnp.float32)


if __name__ == "__main__":
    key = jax.random.PRNGKey(0)
    k_x, k_x2, k_p = jax.random.split(key, 3)

    w1_t, b1, w2_t, b2 = init_params(k_p)
    params = prepare_params(w1_t, b1, w2_t, b2)   # one-time weight prep

    # --- small batch (single partial tile) ---
    B = 4
    x = jax.random.normal(k_x, (B, IN_DIM), jnp.float32)
    logits = jax.block_until_ready(nli_classifier_forward(x, params))
    assert logits.shape == (B, OUT_DIM)

    ref_bf = _reference_bf16(x, w1_t, b1, w2_t, b2)
    ref_f32 = jnp.maximum(x @ w1_t + b1, 0.0) @ w2_t + b2
    assert jnp.allclose(logits, ref_bf, atol=5e-3, rtol=5e-3)
    assert jnp.allclose(logits, ref_f32, atol=5e-2, rtol=5e-2)

    # --- non-multiple batch exercising multi-tile + partial edge block path ---
    B2 = 300
    x2 = jax.random.normal(k_x2, (B2, IN_DIM), jnp.float32)
    logits2 = jax.block_until_ready(
        nli_classifier_forward(x2, params, tile_b=128))
    assert logits2.shape == (B2, OUT_DIM)
    ref2 = _reference_bf16(x2, w1_t, b1, w2_t, b2)
    assert jnp.allclose(logits2, ref2, atol=5e-3, rtol=5e-3)

    print("KERNEL_OK")
</pallas_src>

<mosaic_0001>
module attributes {stable_mosaic.version = 11 : i64} {
  func.func @_nli_mlp_kernel(%arg0: i32, %arg1: memref<8x768xf32, #tpu.memory_space<vmem>>, %arg2: memref<768x512xbf16, #tpu.memory_space<vmem>>, %arg3: memref<1x512xf32, #tpu.memory_space<vmem>>, %arg4: memref<512x128xbf16, #tpu.memory_space<vmem>>, %arg5: memref<1x128xf32, #tpu.memory_space<vmem>>, %arg6: memref<8x128xbf16, #tpu.memory_space<vmem>>) attributes {dimension_semantics = [#tpu.dimension_semantics<parallel>], iteration_bounds = array<i64: 1>, scalar_prefetch = 0 : i64, scratch_operands = 0 : i64, tpu.core_type = #tpu.core_type<tc>, window_params = [{transform_indices = @transform_0, window_bounds = array<i64: 8, 768>}, {pipeline_mode = #tpu.pipeline_mode<synchronous>, transform_indices = @transform_1, window_bounds = array<i64: 768, 512>}, {pipeline_mode = #tpu.pipeline_mode<synchronous>, transform_indices = @transform_2, window_bounds = array<i64: 1, 512>}, {pipeline_mode = #tpu.pipeline_mode<synchronous>, transform_indices = @transform_3, window_bounds = array<i64: 512, 128>}, {pipeline_mode = #tpu.pipeline_mode<synchronous>, transform_indices = @transform_4, window_bounds = array<i64: 1, 128>}, {transform_indices = @transform_5, window_bounds = array<i64: 8, 128>}]} {
    %c0 = arith.constant 0 : index
    %c0_0 = arith.constant 0 : index
    %0 = vector.load %arg1[%c0, %c0_0] : memref<8x768xf32, #tpu.memory_space<vmem>>, vector<8x768xf32>
    %1 = arith.truncf %0 : vector<8x768xf32> to vector<8x768xbf16>
    %c0_1 = arith.constant 0 : index
    %c0_2 = arith.constant 0 : index
    %2 = vector.load %arg2[%c0_1, %c0_2] : memref<768x512xbf16, #tpu.memory_space<vmem>>, vector<768x512xbf16>
    %cst = arith.constant dense<0.000000e+00> : vector<8x512xf32>
    %3 = tpu.matmul %1, %2, %cst {dimension_numbers = #tpu.dot_dimension_numbers<[1], [0], [0], [1], [0, 0, 1, 1], [], []>} : vector<8x768xbf16>, vector<768x512xbf16>, vector<8x512xf32> -> vector<8x512xf32>
    %c0_3 = arith.constant 0 : index
    %c0_4 = arith.constant 0 : index
    %4 = vector.load %arg3[%c0_3, %c0_4] : memref<1x512xf32, #tpu.memory_space<vmem>>, vector<1x512xf32>
    %5 = vector.broadcast %4 : vector<1x512xf32> to vector<8x512xf32>
    %6 = arith.addf %3, %5 : vector<8x512xf32>
    %cst_5 = arith.constant 0.000000e+00 : f32
    %7 = vector.broadcast %cst_5 : f32 to vector<8x512xf32>
    %8 = arith.maximumf %6, %7 : vector<8x512xf32>
    %9 = arith.truncf %8 : vector<8x512xf32> to vector<8x512xbf16>
    %c0_6 = arith.constant 0 : index
    %c0_7 = arith.constant 0 : index
    %10 = vector.load %arg4[%c0_6, %c0_7] : memref<512x128xbf16, #tpu.memory_space<vmem>>, vector<512x128xbf16>
    %cst_8 = arith.constant dense<0.000000e+00> : vector<8x128xf32>
    %11 = tpu.matmul %9, %10, %cst_8 {dimension_numbers = #tpu.dot_dimension_numbers<[1], [0], [0], [1], [0, 0, 1, 1], [], []>} : vector<8x512xbf16>, vector<512x128xbf16>, vector<8x128xf32> -> vector<8x128xf32>
    %c0_9 = arith.constant 0 : index
    %c0_10 = arith.constant 0 : index
    %12 = vector.load %arg5[%c0_9, %c0_10] : memref<1x128xf32, #tpu.memory_space<vmem>>, vector<1x128xf32>
    %13 = vector.broadcast %12 : vector<1x128xf32> to vector<8x128xf32>
    %14 = arith.addf %11, %13 : vector<8x128xf32>
    %15 = arith.truncf %14 : vector<8x128xf32> to vector<8x128xbf16>
    %c0_11 = arith.constant 0 : index
    %c0_12 = arith.constant 0 : index
    %16 = vector.load %arg6[%c0_11, %c0_12] : memref<8x128xbf16, #tpu.memory_space<vmem>>, vector<8x128xbf16>
    tpu.vector_store %arg6[%c0_11, %c0_12], %15 {strides = array<i32>} : memref<8x128xbf16, #tpu.memory_space<vmem>>, vector<8x128xbf16>,
    return
  }
  func.func @transform_0(%arg0: i32) -> (i32, i32) {
    %c0_i32 = arith.constant 0 : i32
    %c0_i32_0 = arith.constant 0 : i32
    return %arg0, %c0_i32 : i32, i32
  }
  func.func @transform_1(%arg0: i32) -> (i32, i32) {
    %c0_i32 = arith.constant 0 : i32
    %c0_i32_0 = arith.constant 0 : i32
    %c0_i32_1 = arith.constant 0 : i32
    return %c0_i32, %c0_i32_0 : i32, i32
  }
  func.func @transform_2(%arg0: i32) -> (i32, i32) {
    %c0_i32 = arith.constant 0 : i32
    %c0_i32_0 = arith.constant 0 : i32
    %c0_i32_1 = arith.constant 0 : i32
    return %c0_i32, %c0_i32_0 : i32, i32
  }
  func.func @transform_3(%arg0: i32) -> (i32, i32) {
    %c0_i32 = arith.constant 0 : i32
    %c0_i32_0 = arith.constant 0 : i32
    %c0_i32_1 = arith.constant 0 : i32
    return %c0_i32, %c0_i32_0 : i32, i32
  }
  func.func @transform_4(%arg0: i32) -> (i32, i32) {
    %c0_i32 = arith.constant 0 : i32
    %c0_i32_0 = arith.constant 0 : i32
    %c0_i32_1 = arith.constant 0 : i32
    return %c0_i32, %c0_i32_0 : i32, i32
  }
  func.func @transform_5(%arg0: i32) -> (i32, i32) {
    %c0_i32 = arith.constant 0 : i32
    %c0_i32_0 = arith.constant 0 : i32
    return %arg0, %c0_i32 : i32, i32
  }
}

</mosaic_0001>

<bundles_post_ra>
// kernel: tpu_custom_call.1
= control target key start
LH: loop header
LB: loop body
LE: loop exit
PB: predicated region body
PF: predicated region fallthrough
CT: control target
= control target key end

     0   :  { %10 = vsyncpa [#allocation3], 0  ;;  %s2719_s0 = inlined_call_operand.hbm [shape: f32[4,768], index: 0, kind: input, shape index: {}]   ;;  %s2720_s1 = inlined_call_operand.hbm [shape: bf16[768,512], index: 1, kind: input, shape index: {}]   ;;  %s2721_s2 = inlined_call_operand.vmem [shape: f32[1,512], index: 2, kind: input, shape index: {}]   ;;  %s2722_s3 = inlined_call_operand.hbm [shape: bf16[512,128], index: 3, kind: input, shape index: {}]   ;;  %s2723_s4 = inlined_call_operand.vmem [shape: f32[1,128], index: 4, kind: input, shape index: {}]   ;;  %s2724_s5 = inlined_call_operand.hbm [shape: bf16[4,128], index: 5, kind: output, shape index: {}]  }
   0x1   :  { %11 = vsyncpa [#allocation6], 0 }
   0x2   :  { %12 = vsyncpa [#allocation4], 0 }
   0x3   :  { %17 = vsyncadd [#allocation3], 384  ;;  %s2622_s18 = smov [#allocation5]   ;;  %s2528_s22 = scalar_lea.hbm %s2720_s1, 24576 }
   0x4   :  { %s30_s19 = sshll.u32 %s2622_s18, 4  ;;  %p2529_p0 = scmp.ne.s32.totalorder %s2720_s1, %s2528_s22  ;;  %s31_s19 = int_to_ptr.vmem [resolvable:$true] %s30_s19 }
   0x5   :  { %p2532_p1 = scmp.lt.u32.totalorder %s2528_s22, %s2720_s1 }
   0x7   :  { %p2534_p2 = pnand %p2532_p1, %p2529_p0 }
   0x9   :  { %2537 = shalt.err (!%p2534_p2)
}
   0xa   :  { %s2538_s27 = scalar_lea.vmem %s31_s19, 24576  ;;  %p2543_p4 = scmp.lt.s32.totalorder %s31_s19, %s31_s19 }
   0xb   :  { %p2539_p3 = scmp.ne.s32.totalorder %s31_s19, %s2538_s27  ;;  %p2544_p5 = scmp.lt.s32.totalorder %s2538_s27, %s2538_s27 }
   0xd   :  { %p2545_p6 = por %p2544_p5, %p2543_p4 }
   0xf   :  { %p2546_p7 = pnand %p2545_p6, %p2539_p3 }
  0x11   :  { %2549 = shalt.err (!%p2546_p7)
}
  0x12   :  { %s2623_s28 = smov 256   ;;  %s2624_s29 = smov 16  }
  0x13   :  { %36 = dma.hbm_to_vmem [thread:$0]  %s2720_s1, 24576, %s31_s19, [#allocation6], %s2623_s28, %s2623_s28, %s2624_s29  }
  0x14   :  { %s2625_s7 = smov [#allocation2]   ;;  %s2550_s11 = scalar_lea.hbm %s2719_s0, 384 }
  0x15   :  { %s18_s8 = sshll.u32 %s2625_s7, 4  ;;  %p2551_p8 = scmp.ne.s32.totalorder %s2719_s0, %s2550_s11  ;;  %s19_s8 = int_to_ptr.vmem [resolvable:$true] %s18_s8 }
  0x16   :  { %p2554_p9 = scmp.lt.u32.totalorder %s2550_s11, %s2719_s0 }
  0x18   :  { %p2556_p10 = pnand %p2554_p9, %p2551_p8 }
  0x1a   :  { %2559 = shalt.err (!%p2556_p10)
}
  0x1b   :  { %s2560_s16 = scalar_lea.vmem %s19_s8, 384  ;;  %s2564_s1 = scalar_lea.vmem %s19_s8, 768 }
  0x1c   :  { %p2561_p11 = scmp.ne.s32.totalorder %s19_s8, %s2560_s16  ;;  %p2565_p12 = scmp.lt.s32.totalorder %s19_s8, %s19_s8 }
  0x1d   :  { %p2566_p13 = scmp.lt.s32.totalorder %s2564_s1, %s2560_s16 }
  0x1f   :  { %p2567_p0 = por %p2566_p13, %p2565_p12 }
  0x21   :  { %p2568_p1 = pnand %p2567_p0, %p2561_p11 }
  0x23   :  { %2571 = shalt.err (!%p2568_p1)
}
  0x24   :  { %s2626_s17 = smov 384   ;;  %s2627_s18 = smov 24  }
  0x25   :  { %24 = dma.hbm_to_vmem [thread:$0]  %s2719_s0, 384, %s19_s8, [#allocation3], %s2626_s17, %s2626_s17, %s2627_s18  }
  0x26   :  { %s2628_s21 = smov [#allocation7]   ;;  %s2572_s25 = scalar_lea.hbm %s2722_s3, 4096 }
  0x27   :  { %s44_s22 = sshll.u32 %s2628_s21, 4  ;;  %p2573_p2 = scmp.ne.s32.totalorder %s2722_s3, %s2572_s25  ;;  %s45_s22 = int_to_ptr.vmem [resolvable:$true] %s44_s22 }
  0x28   :  { %p2576_p3 = scmp.lt.u32.totalorder %s2572_s25, %s2722_s3 }
  0x2a   :  { %p2578_p4 = pnand %p2576_p3, %p2573_p2 }
  0x2c   :  { %2581 = shalt.err (!%p2578_p4)
}
  0x2d   :  { %s2582_s30 = scalar_lea.vmem %s45_s22, 4096  ;;  %p2587_p6 = scmp.lt.s32.totalorder %s45_s22, %s45_s22 }
  0x2e   :  { %p2583_p5 = scmp.ne.s32.totalorder %s45_s22, %s2582_s30  ;;  %p2588_p7 = scmp.lt.s32.totalorder %s2582_s30, %s2582_s30 }
  0x30   :  { %p2589_p8 = por %p2588_p7, %p2587_p6 }
  0x32   :  { %p2590_p9 = pnand %p2589_p8, %p2583_p5 }
  0x34   :  { %2593 = shalt.err (!%p2590_p9)
}
  0x35   :  { %s2629_s0 = smov 64   ;;  %s2630_s6 = smov 4  }
  0x36   :  { %50 = dma.hbm_to_vmem [thread:$0]  %s2722_s3, 4096, %s45_s22, [#allocation6], %s2629_s0, %s2629_s0, %s2630_s6  }
  0x37   :  { %2616 = dma.done.wait [#allocation3], 768  }
  0x38   :  { %2617 = vsyncadd [#allocation3], 4294966528 }
  0x39   :  { %2618 = dma.done.wait [#allocation6], 28672  }
  0x3a   :  { %2619 = vsyncadd [#allocation6], 4294938624  ;;  %v2199_v0 = vld [vmem:[#allocation5 + $0x4] ss:$16 sps:$4 sm:$0xff]   ;;  %v2201_v1 = vld [vmem:[#allocation5 + $0xc] ss:$16 sps:$4 sm:$0xff]  }
  0x3b   :  { %1267 = vmatprep.subr.bf16.mxu0 %v2199_v0  ;;  %v2203_v2 = vld [vmem:[#allocation5] ss:$16 sps:$4 sm:$0xff]   ;;  %v2204_v3 = vld [vmem:[#allocation5 + $0x8] ss:$16 sps:$4 sm:$0xff]   ;;  %1390 = vmatprep.subr.bf16.mxu1 %v2201_v1  ;;  %v2205_v4 = vld [vmem:[#allocation5 + $0x24] ss:$16 sps:$4 sm:$0xff]  }
  0x3c   :  { %1268 = vmatpush1.bf16.msra.mxu0 %v2203_v2  ;;  %1391 = vmatpush1.bf16.msra.mxu1 %v2204_v3  ;;  %v2207_v5 = vld [vmem:[#allocation5 + $0x2c] ss:$16 sps:$4 sm:$0xff]   ;;  %v2209_v6 = vld [vmem:[#allocation5 + $0x20] ss:$16 sps:$4 sm:$0xff]   ;;  %v2210_v7 = vld [vmem:[#allocation5 + $0x28] ss:$16 sps:$4 sm:$0xff]  }
  0x3d   :  { %1269 = vmatprep.subr.bf16.mxu0 %v2205_v4  ;;  %1392 = vmatprep.subr.bf16.mxu1 %v2207_v5  ;;  %v2211_v8 = vld [vmem:[#allocation5 + $0x44] ss:$16 sps:$4 sm:$0xff]   ;;  %v2213_v9 = vld [vmem:[#allocation5 + $0x4c] ss:$16 sps:$4 sm:$0xff]   ;;  %v2215_v10 = vld [vmem:[#allocation5 + $0x40] ss:$16 sps:$4 sm:$0xff]  }
  0x3e   :  { %v2216_v11 = vld [vmem:[#allocation5 + $0x48] ss:$16 sps:$4 sm:$0xff]   ;;  %v2217_v12 = vld [vmem:[#allocation5 + $0x64] ss:$16 sps:$4 sm:$0xff]   ;;  %v2219_v13 = vld [vmem:[#allocation5 + $0x6c] ss:$16 sps:$4 sm:$0xff]  }
  0x3f   :  { %v2221_v14 = vld [vmem:[#allocation5 + $0x60] ss:$16 sps:$4 sm:$0xff]   ;;  %v2222_v15 = vld [vmem:[#allocation5 + $0x68] ss:$16 sps:$4 sm:$0xff]   ;;  %v2223_v16 = vld [vmem:[#allocation5 + $0x84] ss:$16 sps:$4 sm:$0xff]  }
  0x40   :  { %1270 = vmatpush1.bf16.msra.mxu0 %v2209_v6  ;;  %1393 = vmatpush1.bf16.msra.mxu1 %v2210_v7  ;;  %v2225_v17 = vld [vmem:[#allocation5 + $0x8c] ss:$16 sps:$4 sm:$0xff]   ;;  %v2227_v18 = vld [vmem:[#allocation5 + $0x80] ss:$16 sps:$4 sm:$0xff]   ;;  %v2228_v19 = vld [vmem:[#allocation5 + $0x88] ss:$16 sps:$4 sm:$0xff]  }
  0x41   :  { %1271 = vmatprep.subr.bf16.mxu0 %v2211_v8  ;;  %1394 = vmatprep.subr.bf16.mxu1 %v2213_v9  ;;  %v2229_v20 = vld [vmem:[#allocation5 + $0xa4] ss:$16 sps:$4 sm:$0xff]   ;;  %v2231_v21 = vld [vmem:[#allocation5 + $0xac] ss:$16 sps:$4 sm:$0xff]   ;;  %v2233_v22 = vld [vmem:[#allocation5 + $0xa0] ss:$16 sps:$4 sm:$0xff]  }
  0x42   :  { %v2234_v23 = vld [vmem:[#allocation5 + $0xa8] ss:$16 sps:$4 sm:$0xff]   ;;  %v2235_v24 = vld [vmem:[#allocation5 + $0xc4] ss:$16 sps:$4 sm:$0xff]   ;;  %v2237_v25 = vld [vmem:[#allocation5 + $0xcc] ss:$16 sps:$4 sm:$0xff]  }
  0x43   :  { %v2239_v26 = vld [vmem:[#allocation5 + $0xc0] ss:$16 sps:$4 sm:$0xff]   ;;  %v2240_v27 = vld [vmem:[#allocation5 + $0xc8] ss:$16 sps:$4 sm:$0xff]   ;;  %v2241_v28 = vld [vmem:[#allocation5 + $0xe4] ss:$16 sps:$4 sm:$0xff]  }
  0x44   :  { %1272 = vmatpush1.bf16.msra.mxu0 %v2215_v10  ;;  %1395 = vmatpush1.bf16.msra.mxu1 %v2216_v11  ;;  %v2243_v29 = vld [vmem:[#allocation5 + $0xec] ss:$16 sps:$4 sm:$0xff]   ;;  %v2245_v30 = vld [vmem:[#allocation5 + $0xe0] ss:$16 sps:$4 sm:$0xff]   ;;  %v2246_v31 = vld [vmem:[#allocation5 + $0xe8] ss:$16 sps:$4 sm:$0xff]  }
  0x45   :  { %1273 = vmatprep.subr.bf16.mxu0 %v2217_v12  ;;  %1396 = vmatprep.subr.bf16.mxu1 %v2219_v13  ;;  %v2247_v32 = vld [vmem:[#allocation5 + $0x104] ss:$16 sps:$4 sm:$0xff]   ;;  %v2249_v33 = vld [vmem:[#allocation5 + $0x10c] ss:$16 sps:$4 sm:$0xff]   ;;  %v2251_v34 = vld [vmem:[#allocation5 + $0x100] ss:$16 sps:$4 sm:$0xff]  }
  0x46   :  { %v2252_v35 = vld [vmem:[#allocation5 + $0x108] ss:$16 sps:$4 sm:$0xff]   ;;  %v2253_v36 = vld [vmem:[#allocation5 + $0x124] ss:$16 sps:$4 sm:$0xff]   ;;  %v2255_v37 = vld [vmem:[#allocation5 + $0x12c] ss:$16 sps:$4 sm:$0xff]  }
  0x47   :  { %v2257_v38 = vld [vmem:[#allocation5 + $0x120] ss:$16 sps:$4 sm:$0xff]   ;;  %v2258_v39 = vld [vmem:[#allocation5 + $0x128] ss:$16 sps:$4 sm:$0xff]   ;;  %v2259_v40 = vld [vmem:[#allocation5 + $0x144] ss:$16 sps:$4 sm:$0xff]  }
  0x48   :  { %1274 = vmatpush1.bf16.msra.mxu0 %v2221_v14  ;;  %1397 = vmatpush1.bf16.msra.mxu1 %v2222_v15  ;;  %v2261_v41 = vld [vmem:[#allocation5 + $0x14c] ss:$16 sps:$4 sm:$0xff]   ;;  %v2263_v42 = vld [vmem:[#allocation5 + $0x140] ss:$16 sps:$4 sm:$0xff]   ;;  %v2264_v43 = vld [vmem:[#allocation5 + $0x148] ss:$16 sps:$4 sm:$0xff]  }
  0x49   :  { %1275 = vmatprep.subr.bf16.mxu0 %v2223_v16  ;;  %1398 = vmatprep.subr.bf16.mxu1 %v2225_v17  ;;  %v2265_v44 = vld [vmem:[#allocation5 + $0x164] ss:$16 sps:$4 sm:$0xff]   ;;  %v2267_v45 = vld [vmem:[#allocation5 + $0x16c] ss:$16 sps:$4 sm:$0xff]   ;;  %v2269_v46 = vld [vmem:[#allocation5 + $0x160] ss:$16 sps:$4 sm:$0xff]  }
  0x4a   :  { %v2270_v47 = vld [vmem:[#allocation5 + $0x168] ss:$16 sps:$4 sm:$0xff]   ;;  %v2297_v48 = vld [vmem:[#allocation2 + $0x4] ss:$24 sps:$4 sm:$0xff]   ;;  %v2275_v52 = vld [vmem:[#allocation5 + $0x180] ss:$16 sps:$4 sm:$0xff]  }
  0x4b   :  { %v2271_v49 = vld [vmem:[#allocation5 + $0x184] ss:$16 sps:$4 sm:$0xff]   ;;  %v2273_v50 = vld [vmem:[#allocation5 + $0x18c] ss:$16 sps:$4 sm:$0xff]   ;;  %v88_v51 = vpack.c.bf16 %v2297_v48, %v2297_v48  ;;  %v2276_v53 = vld [vmem:[#allocation5 + $0x188] ss:$16 sps:$4 sm:$0xff]  }
  0x4c   :  { %1276 = vmatpush1.bf16.msra.mxu0 %v2227_v18  ;;  %1399 = vmatpush1.bf16.msra.mxu1 %v2228_v19  ;;  %v2277_v54 = vld [vmem:[#allocation5 + $0x1a4] ss:$16 sps:$4 sm:$0xff]   ;;  %v2279_v55 = vld [vmem:[#allocation5 + $0x1ac] ss:$16 sps:$4 sm:$0xff]   ;;  %v2281_v56 = vld [vmem:[#allocation5 + $0x1a0] ss:$16 sps:$4 sm:$0xff]  }
  0x4d   :  { %1277 = vmatprep.subr.bf16.mxu0 %v2229_v20  ;;  %1400 = vmatprep.subr.bf16.mxu1 %v2231_v21  ;;  %v2282_v57 = vld [vmem:[#allocation5 + $0x1a8] ss:$16 sps:$4 sm:$0xff]   ;;  %v2283_v58 = vld [vmem:[#allocation5 + $0x1c4] ss:$16 sps:$4 sm:$0xff]   ;;  %v2285_v59 = vld [vmem:[#allocation5 + $0x1cc] ss:$16 sps:$4 sm:$0xff]  }
  0x4e   :  { %1299 = vmatprep.mubr.bf16.mxu0 %v88_v51  ;;  %1422 = vmatprep.mubr.bf16.mxu1 %v88_v51  ;;  %v2287_v60 = vld [vmem:[#allocation5 + $0x1c0] ss:$16 sps:$4 sm:$0xff]   ;;  %v2288_v61 = vld [vmem:[#allocation5 + $0x1c8] ss:$16 sps:$4 sm:$0xff]   ;;  %v2289_v62 = vld [vmem:[#allocation5 + $0x1e4] ss:$16 sps:$4 sm:$0xff]  }
  0x4f   :  { %v2291_v63 = vld [vmem:[#allocation5 + $0x1ec] ss:$16 sps:$4 sm:$0xff]   ;;  %v2293_v0 = vld [vmem:[#allocation5 + $0x1e0] ss:$16 sps:$4 sm:$0xff]   ;;  %v2294_v1 = vld [vmem:[#allocation5 + $0x1e8] ss:$16 sps:$4 sm:$0xff]  }
  0x50   :  { %1278 = vmatpush1.bf16.msra.mxu0 %v2233_v22  ;;  %1401 = vmatpush1.bf16.msra.mxu1 %v2234_v23  ;;  %v2295_v2 = vld [vmem:[#allocation2] ss:$24 sps:$4 sm:$0xff]   ;;  %v2300_v3 = vld [vmem:[#allocation5 + $0x204] ss:$16 sps:$4 sm:$0xff]   ;;  %v2303_v4 = vld [vmem:[#allocation5 + $0x20c] ss:$16 sps:$4 sm:$0xff]  }
  0x51   :  { %1279 = vmatprep.subr.bf16.mxu0 %v2235_v24  ;;  %1402 = vmatprep.subr.bf16.mxu1 %v2237_v25  ;;  %v2298_v5 = vld [vmem:[#allocation5 + $0x200] ss:$16 sps:$4 sm:$0xff]   ;;  %v2301_v6 = vld [vmem:[#allocation5 + $0x208] ss:$16 sps:$4 sm:$0xff]   ;;  %v87_v7 = vpack.c.bf16 %v2295_v2, %v2295_v2  ;;  %v2306_v8 = vld [vmem:[#allocation5 + $0x224] ss:$16 sps:$4 sm:$0xff]  }
  0x52   :  { %v2309_v9 = vld [vmem:[#allocation5 + $0x22c] ss:$16 sps:$4 sm:$0xff]   ;;  %v2304_v10 = vld [vmem:[#allocation5 + $0x220] ss:$16 sps:$4 sm:$0xff]   ;;  %v2307_v11 = vld [vmem:[#allocation5 + $0x228] ss:$16 sps:$4 sm:$0xff]  }
  0x53   :  { %v2312_v12 = vld [vmem:[#allocation5 + $0x244] ss:$16 sps:$4 sm:$0xff]   ;;  %v2315_v13 = vld [vmem:[#allocation5 + $0x24c] ss:$16 sps:$4 sm:$0xff]   ;;  %v2310_v14 = vld [vmem:[#allocation5 + $0x240] ss:$16 sps:$4 sm:$0xff]  }
  0x54   :  { %1280 = vmatpush1.bf16.msra.mxu0 %v2239_v26  ;;  %1403 = vmatpush1.bf16.msra.mxu1 %v2240_v27  ;;  %v2313_v15 = vld [vmem:[#allocation5 + $0x248] ss:$16 sps:$4 sm:$0xff]   ;;  %v2318_v16 = vld [vmem:[#allocation5 + $0x264] ss:$16 sps:$4 sm:$0xff]   ;;  %v2321_v17 = vld [vmem:[#allocation5 + $0x26c] ss:$16 sps:$4 sm:$0xff]  }
  0x55   :  { %1281 = vmatprep.subr.bf16.mxu0 %v2241_v28  ;;  %1404 = vmatprep.subr.bf16.mxu1 %v2243_v29  ;;  %v2316_v18 = vld [vmem:[#allocation5 + $0x260] ss:$16 sps:$4 sm:$0xff]   ;;  %v2319_v19 = vld [vmem:[#allocation5 + $0x268] ss:$16 sps:$4 sm:$0xff]   ;;  %v2324_v20 = vld [vmem:[#allocation5 + $0x284] ss:$16 sps:$4 sm:$0xff]  }
  0x56   :  { %v2327_v21 = vld [vmem:[#allocation5 + $0x28c] ss:$16 sps:$4 sm:$0xff]   ;;  %v2322_v22 = vld [vmem:[#allocation5 + $0x280] ss:$16 sps:$4 sm:$0xff]   ;;  %v2325_v23 = vld [vmem:[#allocation5 + $0x288] ss:$16 sps:$4 sm:$0xff]  }
  0x57   :  { %v2330_v24 = vld [vmem:[#allocation5 + $0x2a4] ss:$16 sps:$4 sm:$0xff]   ;;  %v2333_v25 = vld [vmem:[#allocation5 + $0x2ac] ss:$16 sps:$4 sm:$0xff]   ;;  %v2328_v26 = vld [vmem:[#allocation5 + $0x2a0] ss:$16 sps:$4 sm:$0xff]  }
  0x58   :  { %1282 = vmatpush1.bf16.msra.mxu0 %v2245_v30  ;;  %1405 = vmatpush1.bf16.msra.mxu1 %v2246_v31  ;;  %v2331_v27 = vld [vmem:[#allocation5 + $0x2a8] ss:$16 sps:$4 sm:$0xff]   ;;  %v2336_v28 = vld [vmem:[#allocation5 + $0x2c4] ss:$16 sps:$4 sm:$0xff]   ;;  %v2339_v29 = vld [vmem:[#allocation5 + $0x2cc] ss:$16 sps:$4 sm:$0xff]  }
  0x59   :  { %1283 = vmatprep.subr.bf16.mxu0 %v2247_v32  ;;  %1406 = vmatprep.subr.bf16.mxu1 %v2249_v33  ;;  %v2334_v30 = vld [vmem:[#allocation5 + $0x2c0] ss:$16 sps:$4 sm:$0xff]   ;;  %v2337_v31 = vld [vmem:[#allocation5 + $0x2c8] ss:$16 sps:$4 sm:$0xff]   ;;  %v2396_v32 = vld [vmem:[#allocation2 + $0xc] ss:$24 sps:$4 sm:$0xff]  }
  0x5a   :  { %v2342_v33 = vld [vmem:[#allocation5 + $0x2e4] ss:$16 sps:$4 sm:$0xff]   ;;  %v2358_v48 = vld [vmem:[#allocation5 + $0x340] ss:$16 sps:$4 sm:$0xff]   ;;  %v2369_v51 = vld [vmem:[#allocation5 + $0x36c] ss:$16 sps:$4 sm:$0xff]  }
  0x5b   :  { %v2390_v2 = vld [vmem:[#allocation5 + $0x3e4] ss:$16 sps:$4 sm:$0xff]  }
  0x5c   :  { %1284 = vmatpush1.bf16.msra.mxu0 %v2251_v34  ;;  %1407 = vmatpush1.bf16.msra.mxu1 %v2252_v35  ;;  %v2345_v34 = vld [vmem:[#allocation5 + $0x2ec] ss:$16 sps:$4 sm:$0xff]   ;;  %v90_v35 = vpack.c.bf16 %v2396_v32, %v2396_v32  ;;  %v2427_v32 = vld [vmem:[#allocation5 + $0x4a0] ss:$16 sps:$4 sm:$0xff]  }
  0x5d   :  { %1285 = vmatprep.subr.bf16.mxu0 %v2253_v36  ;;  %1408 = vmatprep.subr.bf16.mxu1 %v2255_v37  ;;  %v2340_v36 = vld [vmem:[#allocation5 + $0x2e0] ss:$16 sps:$4 sm:$0xff]   ;;  %v2343_v37 = vld [vmem:[#allocation5 + $0x2e8] ss:$16 sps:$4 sm:$0xff]  }
  0x60   :  { %1286 = vmatpush1.bf16.msra.mxu0 %v2257_v38  ;;  %1409 = vmatpush1.bf16.msra.mxu1 %v2258_v39  ;;  %v2348_v38 = vld [vmem:[#allocation5 + $0x304] ss:$16 sps:$4 sm:$0xff]   ;;  %v2351_v39 = vld [vmem:[#allocation5 + $0x30c] ss:$16 sps:$4 sm:$0xff]  }
  0x61   :  { %1287 = vmatprep.subr.bf16.mxu0 %v2259_v40  ;;  %1410 = vmatprep.subr.bf16.mxu1 %v2261_v41  ;;  %v2346_v40 = vld [vmem:[#allocation5 + $0x300] ss:$16 sps:$4 sm:$0xff]   ;;  %v2349_v41 = vld [vmem:[#allocation5 + $0x308] ss:$16 sps:$4 sm:$0xff]  }
  0x64   :  { %1288 = vmatpush1.bf16.msra.mxu0 %v2263_v42  ;;  %1411 = vmatpush1.bf16.msra.mxu1 %v2264_v43  ;;  %v2354_v42 = vld [vmem:[#allocation5 + $0x324] ss:$16 sps:$4 sm:$0xff]   ;;  %v2357_v43 = vld [vmem:[#allocation5 + $0x32c] ss:$16 sps:$4 sm:$0xff]  }
  0x65   :  { %1289 = vmatprep.subr.bf16.mxu0 %v2265_v44  ;;  %1412 = vmatprep.subr.bf16.mxu1 %v2267_v45  ;;  %v2352_v44 = vld [vmem:[#allocation5 + $0x320] ss:$16 sps:$4 sm:$0xff]   ;;  %v2355_v45 = vld [vmem:[#allocation5 + $0x328] ss:$16 sps:$4 sm:$0xff]  }
  0x68   :  { %1290 = vmatpush1.bf16.msra.mxu0 %v2269_v46  ;;  %1413 = vmatpush1.bf16.msra.mxu1 %v2270_v47  ;;  %v2360_v46 = vld [vmem:[#allocation5 + $0x344] ss:$16 sps:$4 sm:$0xff]   ;;  %v2363_v47 = vld [vmem:[#allocation5 + $0x34c] ss:$16 sps:$4 sm:$0xff]  }
  0x69   :  { %1291 = vmatprep.subr.bf16.mxu0 %v2271_v49  ;;  %1414 = vmatprep.subr.bf16.mxu1 %v2273_v50  ;;  %v2361_v49 = vld [vmem:[#allocation5 + $0x348] ss:$16 sps:$4 sm:$0xff]   ;;  %v2366_v50 = vld [vmem:[#allocation5 + $0x364] ss:$16 sps:$4 sm:$0xff]  }
  0x6c   :  { %1292 = vmatpush1.bf16.msra.mxu0 %v2275_v52  ;;  %1415 = vmatpush1.bf16.msra.mxu1 %v2276_v53  ;;  %v2364_v52 = vld [vmem:[#allocation5 + $0x360] ss:$16 sps:$4 sm:$0xff]   ;;  %v2367_v53 = vld [vmem:[#allocation5 + $0x368] ss:$16 sps:$4 sm:$0xff]  }
  0x6d   :  { %1293 = vmatprep.subr.bf16.mxu0 %v2277_v54  ;;  %1416 = vmatprep.subr.bf16.mxu1 %v2279_v55  ;;  %v2372_v54 = vld [vmem:[#allocation5 + $0x384] ss:$16 sps:$4 sm:$0xff]   ;;  %v2375_v55 = vld [vmem:[#allocation5 + $0x38c] ss:$16 sps:$4 sm:$0xff]  }
  0x70   :  { %1294 = vmatpush1.bf16.msra.mxu0 %v2281_v56  ;;  %1417 = vmatpush1.bf16.msra.mxu1 %v2282_v57  ;;  %v2370_v56 = vld [vmem:[#allocation5 + $0x380] ss:$16 sps:$4 sm:$0xff]   ;;  %v2373_v57 = vld [vmem:[#allocation5 + $0x388] ss:$16 sps:$4 sm:$0xff]  }
  0x71   :  { %1295 = vmatprep.subr.bf16.mxu0 %v2283_v58  ;;  %1418 = vmatprep.subr.bf16.mxu1 %v2285_v59  ;;  %v2378_v58 = vld [vmem:[#allocation5 + $0x3a4] ss:$16 sps:$4 sm:$0xff]   ;;  %v2381_v59 = vld [vmem:[#allocation5 + $0x3ac] ss:$16 sps:$4 sm:$0xff]  }
  0x74   :  { %1296 = vmatpush1.bf16.msra.mxu0 %v2287_v60  ;;  %1419 = vmatpush1.bf16.msra.mxu1 %v2288_v61  ;;  %v2376_v60 = vld [vmem:[#allocation5 + $0x3a0] ss:$16 sps:$4 sm:$0xff]   ;;  %v2379_v61 = vld [vmem:[#allocation5 + $0x3a8] ss:$16 sps:$4 sm:$0xff]  }
  0x75   :  { %1297 = vmatprep.subr.bf16.mxu0 %v2289_v62  ;;  %1420 = vmatprep.subr.bf16.mxu1 %v2291_v63  ;;  %v2384_v62 = vld [vmem:[#allocation5 + $0x3c4] ss:$16 sps:$4 sm:$0xff]   ;;  %v2387_v63 = vld [vmem:[#allocation5 + $0x3cc] ss:$16 sps:$4 sm:$0xff]  }
  0x78   :  { %1298 = vmatpush1.bf16.msra.mxu0 %v2293_v0  ;;  %1421 = vmatpush1.bf16.msra.mxu1 %v2294_v1  ;;  %v2382_v0 = vld [vmem:[#allocation5 + $0x3c0] ss:$16 sps:$4 sm:$0xff]   ;;  %v2385_v1 = vld [vmem:[#allocation5 + $0x3c8] ss:$16 sps:$4 sm:$0xff]  }
  0x79   :  { %1308 = vmatprep.subr.bf16.mxu0 %v2300_v3  ;;  %1431 = vmatprep.subr.bf16.mxu1 %v2303_v4  ;;  %v2393_v3 = vld [vmem:[#allocation5 + $0x3ec] ss:$16 sps:$4 sm:$0xff]   ;;  %v2388_v4 = vld [vmem:[#allocation5 + $0x3e0] ss:$16 sps:$4 sm:$0xff]  }
  0x7b   :  { %1300 = vmatmul.mubr.bf16.vlgmr.msra.gmra.mrb[0].mxu0 %v87_v7  ;;  %1423 = vmatmul.mubr.bf16.vlgmr.msra.gmra.mrb[0].mxu1 %v87_v7  ;;  %v2399_v7 = vld [vmem:[#allocation5 + $0x404] ss:$16 sps:$4 sm:$0xff]  }
  0x7c   :  { %1309 = vmatpush1.bf16.msra.mxu0 %v2298_v5  ;;  %1432 = vmatpush1.bf16.msra.mxu1 %v2301_v6  ;;  %v2391_v5 = vld [vmem:[#allocation5 + $0x3e8] ss:$16 sps:$4 sm:$0xff]  }
  0x7d   :  { %1310 = vmatprep.subr.bf16.mxu0 %v2306_v8  ;;  %1433 = vmatprep.subr.bf16.mxu1 %v2309_v9  ;;  %v2394_v6 = vld [vmem:[#allocation2 + $0x8] ss:$24 sps:$4 sm:$0xff]   ;;  %v2402_v8 = vld [vmem:[#allocation5 + $0x40c] ss:$16 sps:$4 sm:$0xff]  }
  0x7e   :  { %1340 = vmatprep.mubr.bf16.mxu0 %v90_v35  ;;  %1463 = vmatprep.mubr.bf16.mxu1 %v90_v35  ;;  %v89_v9 = vpack.c.bf16 %v2394_v6, %v2394_v6  ;;  %v2438_v35 = vld [vmem:[#allocation5 + $0x4cc] ss:$16 sps:$4 sm:$0xff]   ;;  %v2489_v6 = vld [vmem:[#allocation5 + $0x5e4] ss:$16 sps:$4 sm:$0xff]  }
  0x80   :  { %1311 = vmatpush1.bf16.msra.mxu0 %v2304_v10  ;;  %1434 = vmatpush1.bf16.msra.mxu1 %v2307_v11  ;;  %v2397_v10 = vld [vmem:[#allocation5 + $0x400] ss:$16 sps:$4 sm:$0xff]   ;;  %v2400_v11 = vld [vmem:[#allocation5 + $0x408] ss:$16 sps:$4 sm:$0xff]  }
  0x81   :  { %1312 = vmatprep.subr.bf16.mxu0 %v2312_v12  ;;  %1435 = vmatprep.subr.bf16.mxu1 %v2315_v13  ;;  %v2405_v12 = vld [vmem:[#allocation5 + $0x424] ss:$16 sps:$4 sm:$0xff]   ;;  %v2408_v13 = vld [vmem:[#allocation5 + $0x42c] ss:$16 sps:$4 sm:$0xff]  }
  0x84   :  { %1313 = vmatpush1.bf16.msra.mxu0 %v2310_v14  ;;  %1436 = vmatpush1.bf16.msra.mxu1 %v2313_v15  ;;  %v2403_v14 = vld [vmem:[#allocation5 + $0x420] ss:$16 sps:$4 sm:$0xff]   ;;  %v2406_v15 = vld [vmem:[#allocation5 + $0x428] ss:$16 sps:$4 sm:$0xff]  }
  0x85   :  { %1314 = vmatprep.subr.bf16.mxu0 %v2318_v16  ;;  %1437 = vmatprep.subr.bf16.mxu1 %v2321_v17  ;;  %v2495_v16 = vld [vmem:[#allocation2 + $0x14] ss:$24 sps:$4 sm:$0xff]  }
  0x86   :  { %v2411_v17 = vld [vmem:[#allocation5 + $0x444] ss:$16 sps:$4 sm:$0xff]  }
  0x88   :  { %1315 = vmatpush1.bf16.msra.mxu0 %v2316_v18  ;;  %1438 = vmatpush1.bf16.msra.mxu1 %v2319_v19  ;;  %v2414_v18 = vld [vmem:[#allocation5 + $0x44c] ss:$16 sps:$4 sm:$0xff]   ;;  %v92_v19 = vpack.c.bf16 %v2495_v16, %v2495_v16 }
  0x89   :  { %1316 = vmatprep.subr.bf16.mxu0 %v2324_v20  ;;  %1439 = vmatprep.subr.bf16.mxu1 %v2327_v21  ;;  %v2409_v20 = vld [vmem:[#allocation5 + $0x440] ss:$16 sps:$4 sm:$0xff]   ;;  %v2412_v21 = vld [vmem:[#allocation5 + $0x448] ss:$16 sps:$4 sm:$0xff]  }
  0x8a   :  { %v2500_v16 = vld [vmem:[#allocation7 + $0x48] sm:$0xff]  }
  0x8c   :  { %1317 = vmatpush1.bf16.msra.mxu0 %v2322_v22  ;;  %1440 = vmatpush1.bf16.msra.mxu1 %v2325_v23  ;;  %v2417_v22 = vld [vmem:[#allocation5 + $0x464] ss:$16 sps:$4 sm:$0xff]   ;;  %v2420_v23 = vld [vmem:[#allocation5 + $0x46c] ss:$16 sps:$4 sm:$0xff]  }
  0x8d   :  { %1318 = vmatprep.subr.bf16.mxu0 %v2330_v24  ;;  %1441 = vmatprep.subr.bf16.mxu1 %v2333_v25  ;;  %v2415_v24 = vld [vmem:[#allocation5 + $0x460] ss:$16 sps:$4 sm:$0xff]   ;;  %v2418_v25 = vld [vmem:[#allocation5 + $0x468] ss:$16 sps:$4 sm:$0xff]  }
  0x90   :  { %1319 = vmatpush1.bf16.msra.mxu0 %v2328_v26  ;;  %1442 = vmatpush1.bf16.msra.mxu1 %v2331_v27  ;;  %v2423_v26 = vld [vmem:[#allocation5 + $0x484] ss:$16 sps:$4 sm:$0xff]   ;;  %v2426_v27 = vld [vmem:[#allocation5 + $0x48c] ss:$16 sps:$4 sm:$0xff]  }
  0x91   :  { %1320 = vmatprep.subr.bf16.mxu0 %v2336_v28  ;;  %1443 = vmatprep.subr.bf16.mxu1 %v2339_v29  ;;  %v2421_v28 = vld [vmem:[#allocation5 + $0x480] ss:$16 sps:$4 sm:$0xff]   ;;  %v2424_v29 = vld [vmem:[#allocation5 + $0x488] ss:$16 sps:$4 sm:$0xff]  }
  0x94   :  { %1321 = vmatpush1.bf16.msra.mxu0 %v2334_v30  ;;  %1444 = vmatpush1.bf16.msra.mxu1 %v2337_v31  ;;  %v2429_v30 = vld [vmem:[#allocation5 + $0x4a4] ss:$16 sps:$4 sm:$0xff]   ;;  %v2432_v31 = vld [vmem:[#allocation5 + $0x4ac] ss:$16 sps:$4 sm:$0xff]  }
  0x95   :  { %1322 = vmatprep.subr.bf16.mxu0 %v2342_v33  ;;  %1445 = vmatprep.subr.bf16.mxu1 %v2345_v34  ;;  %v2430_v33 = vld [vmem:[#allocation5 + $0x4a8] ss:$16 sps:$4 sm:$0xff]   ;;  %v2435_v34 = vld [vmem:[#allocation5 + $0x4c4] ss:$16 sps:$4 sm:$0xff]  }
  0x98   :  { %1323 = vmatpush1.bf16.msra.mxu0 %v2340_v36  ;;  %1446 = vmatpush1.bf16.msra.mxu1 %v2343_v37  ;;  %v2433_v36 = vld [vmem:[#allocation5 + $0x4c0] ss:$16 sps:$4 sm:$0xff]   ;;  %v2436_v37 = vld [vmem:[#allocation5 + $0x4c8] ss:$16 sps:$4 sm:$0xff]  }
  0x99   :  { %1324 = vmatprep.subr.bf16.mxu0 %v2348_v38  ;;  %1447 = vmatprep.subr.bf16.mxu1 %v2351_v39  ;;  %v2441_v38 = vld [vmem:[#allocation5 + $0x4e4] ss:$16 sps:$4 sm:$0xff]   ;;  %v2444_v39 = vld [vmem:[#allocation5 + $0x4ec] ss:$16 sps:$4 sm:$0xff]  }
  0x9c   :  { %1325 = vmatpush1.bf16.msra.mxu0 %v2346_v40  ;;  %1448 = vmatpush1.bf16.msra.mxu1 %v2349_v41  ;;  %v2439_v40 = vld [vmem:[#allocation5 + $0x4e0] ss:$16 sps:$4 sm:$0xff]   ;;  %v2442_v41 = vld [vmem:[#allocation5 + $0x4e8] ss:$16 sps:$4 sm:$0xff]  }
  0x9d   :  { %1326 = vmatprep.subr.bf16.mxu0 %v2354_v42  ;;  %1449 = vmatprep.subr.bf16.mxu1 %v2357_v43  ;;  %v2447_v42 = vld [vmem:[#allocation5 + $0x504] ss:$16 sps:$4 sm:$0xff]   ;;  %v2450_v43 = vld [vmem:[#allocation5 + $0x50c] ss:$16 sps:$4 sm:$0xff]  }
  0xa0   :  { %1327 = vmatpush1.bf16.msra.mxu0 %v2352_v44  ;;  %1450 = vmatpush1.bf16.msra.mxu1 %v2355_v45  ;;  %v2445_v44 = vld [vmem:[#allocation5 + $0x500] ss:$16 sps:$4 sm:$0xff]   ;;  %v2448_v45 = vld [vmem:[#allocation5 + $0x508] ss:$16 sps:$4 sm:$0xff]  }
  0xa1   :  { %1328 = vmatprep.subr.bf16.mxu0 %v2360_v46  ;;  %1451 = vmatprep.subr.bf16.mxu1 %v2363_v47  ;;  %v2453_v46 = vld [vmem:[#allocation5 + $0x524] ss:$16 sps:$4 sm:$0xff]   ;;  %v2456_v47 = vld [vmem:[#allocation5 + $0x52c] ss:$16 sps:$4 sm:$0xff]  }
  0xa4   :  { %1329 = vmatpush1.bf16.msra.mxu0 %v2358_v48  ;;  %1452 = vmatpush1.bf16.msra.mxu1 %v2361_v49  ;;  %v2451_v48 = vld [vmem:[#allocation5 + $0x520] ss:$16 sps:$4 sm:$0xff]   ;;  %v2454_v49 = vld [vmem:[#allocation5 + $0x528] ss:$16 sps:$4 sm:$0xff]  }
  0xa5   :  { %1330 = vmatprep.subr.bf16.mxu0 %v2366_v50  ;;  %1453 = vmatprep.subr.bf16.mxu1 %v2369_v51  ;;  %v2459_v50 = vld [vmem:[#allocation5 + $0x544] ss:$16 sps:$4 sm:$0xff]   ;;  %v2462_v51 = vld [vmem:[#allocation5 + $0x54c] ss:$16 sps:$4 sm:$0xff]  }
  0xa8   :  { %1331 = vmatpush1.bf16.msra.mxu0 %v2364_v52  ;;  %1454 = vmatpush1.bf16.msra.mxu1 %v2367_v53  ;;  %v2457_v52 = vld [vmem:[#allocation5 + $0x540] ss:$16 sps:$4 sm:$0xff]   ;;  %v2460_v53 = vld [vmem:[#allocation5 + $0x548] ss:$16 sps:$4 sm:$0xff]  }
  0xa9   :  { %1332 = vmatprep.subr.bf16.mxu0 %v2372_v54  ;;  %1455 = vmatprep.subr.bf16.mxu1 %v2375_v55  ;;  %v2465_v54 = vld [vmem:[#allocation5 + $0x564] ss:$16 sps:$4 sm:$0xff]   ;;  %v2468_v55 = vld [vmem:[#allocation5 + $0x56c] ss:$16 sps:$4 sm:$0xff]  }
  0xac   :  { %1333 = vmatpush1.bf16.msra.mxu0 %v2370_v56  ;;  %1456 = vmatpush1.bf16.msra.mxu1 %v2373_v57  ;;  %v2463_v56 = vld [vmem:[#allocation5 + $0x560] ss:$16 sps:$4 sm:$0xff]   ;;  %v2466_v57 = vld [vmem:[#allocation5 + $0x568] ss:$16 sps:$4 sm:$0xff]  }
  0xad   :  { %1334 = vmatprep.subr.bf16.mxu0 %v2378_v58  ;;  %1457 = vmatprep.subr.bf16.mxu1 %v2381_v59  ;;  %v2471_v58 = vld [vmem:[#allocation5 + $0x584] ss:$16 sps:$4 sm:$0xff]   ;;  %v2474_v59 = vld [vmem:[#allocation5 + $0x58c] ss:$16 sps:$4 sm:$0xff]  }
  0xb0   :  { %1335 = vmatpush1.bf16.msra.mxu0 %v2376_v60  ;;  %1458 = vmatpush1.bf16.msra.mxu1 %v2379_v61  ;;  %v2469_v60 = vld [vmem:[#allocation5 + $0x580] ss:$16 sps:$4 sm:$0xff]   ;;  %v2472_v61 = vld [vmem:[#allocation5 + $0x588] ss:$16 sps:$4 sm:$0xff]  }
  0xb1   :  { %1336 = vmatprep.subr.bf16.mxu0 %v2384_v62  ;;  %1459 = vmatprep.subr.bf16.mxu1 %v2387_v63  ;;  %v2477_v62 = vld [vmem:[#allocation5 + $0x5a4] ss:$16 sps:$4 sm:$0xff]   ;;  %v2480_v63 = vld [vmem:[#allocation5 + $0x5ac] ss:$16 sps:$4 sm:$0xff]  }
  0xb4   :  { %1337 = vmatpush1.bf16.msra.mxu0 %v2382_v0  ;;  %1460 = vmatpush1.bf16.msra.mxu1 %v2385_v1  ;;  %v2475_v0 = vld [vmem:[#allocation5 + $0x5a0] ss:$16 sps:$4 sm:$0xff]   ;;  %v2478_v1 = vld [vmem:[#allocation5 + $0x5a8] ss:$16 sps:$4 sm:$0xff]  }
  0xb5   :  { %1338 = vmatprep.subr.bf16.mxu0 %v2390_v2  ;;  %1461 = vmatprep.subr.bf16.mxu1 %v2393_v3  ;;  %v2483_v2 = vld [vmem:[#allocation5 + $0x5c4] ss:$16 sps:$4 sm:$0xff]   ;;  %v2486_v3 = vld [vmem:[#allocation5 + $0x5cc] ss:$16 sps:$4 sm:$0xff]  }
  0xb8   :  { %1339 = vmatpush1.bf16.msra.mxu0 %v2388_v4  ;;  %1462 = vmatpush1.bf16.msra.mxu1 %v2391_v5  ;;  %v2481_v4 = vld [vmem:[#allocation5 + $0x5c0] ss:$16 sps:$4 sm:$0xff]   ;;  %v2484_v5 = vld [vmem:[#allocation5 + $0x5c8] ss:$16 sps:$4 sm:$0xff]  }
  0xb9   :  { %1349 = vmatprep.subr.bf16.mxu0 %v2399_v7  ;;  %1472 = vmatprep.subr.bf16.mxu1 %v2402_v8  ;;  %v2492_v7 = vld [vmem:[#allocation5 + $0x5ec] ss:$16 sps:$4 sm:$0xff]   ;;  %v2493_v8 = vld [vmem:[#allocation2 + $0x10] ss:$24 sps:$4 sm:$0xff]  }
  0xbb   :  { %1341 = vmatmul.mubr.bf16.vlgmr.msra.gmra.mrb[0].mxu0 %v89_v9  ;;  %1464 = vmatmul.mubr.bf16.vlgmr.msra.gmra.mrb[0].mxu1 %v89_v9  ;;  %v2487_v9 = vld [vmem:[#allocation5 + $0x5e0] ss:$16 sps:$4 sm:$0xff]  }
  0xbc   :  { %1350 = vmatpush1.bf16.msra.mxu0 %v2397_v10  ;;  %1473 = vmatpush1.bf16.msra.mxu1 %v2400_v11  ;;  %v2490_v10 = vld [vmem:[#allocation5 + $0x5e8] ss:$16 sps:$4 sm:$0xff]   ;;  %v2496_v11 = vld [vmem:[#allocation7 + $0x40] sm:$0xff]  }
  0xbd   :  { %1351 = vmatprep.subr.bf16.mxu0 %v2405_v12  ;;  %1474 = vmatprep.subr.bf16.mxu1 %v2408_v13  ;;  %v2497_v12 = vld [vmem:[#allocation7 + $0xc0] sm:$0xff]   ;;  %v91_v13 = vpack.c.bf16 %v2493_v8, %v2493_v8 }
  0xbe   :  { %1381 = vmatprep.mubr.bf16.mxu0 %v92_v19  ;;  %1504 = vmatprep.mubr.bf16.mxu1 %v92_v19  ;;  %v2503_v19 = vld [vmem:[#allocation7 + $0x88] sm:$0xff]  }
  0xc0   :  { %1352 = vmatpush1.bf16.msra.mxu0 %v2403_v14  ;;  %1475 = vmatpush1.bf16.msra.mxu1 %v2406_v15  ;;  %v2498_v14 = vld [vmem:[#allocation7] sm:$0xff]  }
  0xc1   :  { %1353 = vmatprep.subr.bf16.mxu0 %v2411_v17  ;;  %1476 = vmatprep.subr.bf16.mxu1 %v2414_v18  ;;  %v2499_v15 = vld [vmem:[#allocation7 + $0x80] sm:$0xff]   ;;  %v2501_v17 = vld [vmem:[#allocation7 + $0xc8] sm:$0xff]  }
  0xc2   :  { %v2502_v18 = vld [vmem:[#allocation7 + $0x8] sm:$0xff]  }
  0xc4   :  { %1354 = vmatpush1.bf16.msra.mxu0 %v2409_v20  ;;  %1477 = vmatpush1.bf16.msra.mxu1 %v2412_v21  ;;  %v2504_v20 = vld [vmem:[#allocation7 + $0x50] sm:$0xff]  }
  0xc5   :  { %1355 = vmatprep.subr.bf16.mxu0 %v2417_v22  ;;  %1478 = vmatprep.subr.bf16.mxu1 %v2420_v23  ;;  %v2505_v21 = vld [vmem:[#allocation7 + $0xd0] sm:$0xff]  }
  0xc6   :  { %v2506_v22 = vld [vmem:[#allocation7 + $0x10] sm:$0xff]  }
  0xc7   :  { %v2507_v23 = vld [vmem:[#allocation7 + $0x90] sm:$0xff]  }
  0xc8   :  { %1356 = vmatpush1.bf16.msra.mxu0 %v2415_v24  ;;  %1479 = vmatpush1.bf16.msra.mxu1 %v2418_v25  ;;  %v2508_v24 = vld [vmem:[#allocation7 + $0x58] sm:$0xff]  }
  0xc9   :  { %1357 = vmatprep.subr.bf16.mxu0 %v2423_v26  ;;  %1480 = vmatprep.subr.bf16.mxu1 %v2426_v27  ;;  %v2509_v25 = vld [vmem:[#allocation7 + $0xd8] sm:$0xff]  }
  0xca   :  { %v2510_v26 = vld [vmem:[#allocation7 + $0x18] sm:$0xff]  }
  0xcb   :  { %v2511_v27 = vld [vmem:[#allocation7 + $0x98] sm:$0xff]  }
  0xcc   :  { %1358 = vmatpush1.bf16.msra.mxu0 %v2421_v28  ;;  %1481 = vmatpush1.bf16.msra.mxu1 %v2424_v29  ;;  %v2512_v28 = vld [vmem:[#allocation7 + $0x60] sm:$0xff]  }
  0xcd   :  { %1359 = vmatprep.subr.bf16.mxu0 %v2429_v30  ;;  %1482 = vmatprep.subr.bf16.mxu1 %v2432_v31  ;;  %v2513_v29 = vld [vmem:[#allocation7 + $0xe0] sm:$0xff]  }
  0xce   :  { %v2514_v30 = vld [vmem:[#allocation7 + $0x20] sm:$0xff]  }
  0xcf   :  { %v2515_v31 = vld [vmem:[#allocation7 + $0xa0] sm:$0xff]  }
  0xd0   :  { %1360 = vmatpush1.bf16.msra.mxu0 %v2427_v32  ;;  %1483 = vmatpush1.bf16.msra.mxu1 %v2430_v33  ;;  %v2516_v32 = vld [vmem:[#allocation7 + $0x68] sm:$0xff]  }
  0xd1   :  { %1361 = vmatprep.subr.bf16.mxu0 %v2435_v34  ;;  %1484 = vmatprep.subr.bf16.mxu1 %v2438_v35  ;;  %v2517_v33 = vld [vmem:[#allocation7 + $0xe8] sm:$0xff]  }
  0xd2   :  { %v2518_v34 = vld [vmem:[#allocation7 + $0x28] sm:$0xff]  }
  0xd3   :  { %v2519_v35 = vld [vmem:[#allocation7 + $0xa8] sm:$0xff]  }
  0xd4   :  { %1362 = vmatpush1.bf16.msra.mxu0 %v2433_v36  ;;  %1485 = vmatpush1.bf16.msra.mxu1 %v2436_v37  ;;  %v2520_v36 = vld [vmem:[#allocation7 + $0x70] sm:$0xff]  }
  0xd5   :  { %1363 = vmatprep.subr.bf16.mxu0 %v2441_v38  ;;  %1486 = vmatprep.subr.bf16.mxu1 %v2444_v39  ;;  %v2521_v37 = vld [vmem:[#allocation7 + $0xf0] sm:$0xff]  }
  0xd6   :  { %v2522_v38 = vld [vmem:[#allocation7 + $0x30] sm:$0xff]  }
  0xd7   :  { %v2523_v39 = vld [vmem:[#allocation7 + $0xb0] sm:$0xff]  }
  0xd8   :  { %1364 = vmatpush1.bf16.msra.mxu0 %v2439_v40  ;;  %1487 = vmatpush1.bf16.msra.mxu1 %v2442_v41  ;;  %v2524_v40 = vld [vmem:[#allocation7 + $0x78] sm:$0xff]  }
  0xd9   :  { %1365 = vmatprep.subr.bf16.mxu0 %v2447_v42  ;;  %1488 = vmatprep.subr.bf16.mxu1 %v2450_v43  ;;  %v2525_v41 = vld [vmem:[#allocation7 + $0xf8] sm:$0xff]  }
  0xda   :  { %v2526_v42 = vld [vmem:[#allocation7 + $0x38] sm:$0xff]  }
  0xdb   :  { %v2527_v43 = vld [vmem:[#allocation7 + $0xb8] sm:$0xff]  }
  0xdc   :  { %1366 = vmatpush1.bf16.msra.mxu0 %v2445_v44  ;;  %1489 = vmatpush1.bf16.msra.mxu1 %v2448_v45  ;;  %v287_v44 = vlaneseq }
  0xdd   :  { %1367 = vmatprep.subr.bf16.mxu0 %v2453_v46  ;;  %1490 = vmatprep.subr.bf16.mxu1 %v2456_v47 }
  0xde   :  { %v288_v45 = vshrl.u32 %v287_v44, 7 }
  0xe0   :  { %1368 = vmatpush1.bf16.msra.mxu0 %v2451_v48  ;;  %1491 = vmatpush1.bf16.msra.mxu1 %v2454_v49  ;;  %v289_v46 = vsub.s32 0, %v288_v45  ;;  %v297_v47 = vsub.s32 2, %v288_v45  ;;  %v285_v48 = vld [vmem:[%s2721_s2] sm:$0xf]  ;;  %v293_v49 = vsub.s32 1, %v288_v45 }
  0xe1   :  { %1369 = vmatprep.subr.bf16.mxu0 %v2459_v50  ;;  %1492 = vmatprep.subr.bf16.mxu1 %v2462_v51  ;;  %v301_v50 = vsub.s32 3, %v288_v45 }
  0xe2   :  { %v290_v51 = vrot.slane %v285_v48, %v289_v46 }
  0xe4   :  { %1370 = vmatpush1.bf16.msra.mxu0 %v2457_v52  ;;  %1493 = vmatpush1.bf16.msra.mxu1 %v2460_v53  ;;  %v298_v52 = vrot.slane %v285_v48, %v297_v47  ;;  %v294_v53 = vrot.slane %v285_v48, %v293_v49 }
  0xe5   :  { %1371 = vmatprep.subr.bf16.mxu0 %v2465_v54  ;;  %1494 = vmatprep.subr.bf16.mxu1 %v2468_v55  ;;  %v302_v54 = vrot.slane %v285_v48, %v301_v50 }
  0xe8   :  { %1372 = vmatpush1.bf16.msra.mxu0 %v2463_v56  ;;  %1495 = vmatpush1.bf16.msra.mxu1 %v2466_v57 }
  0xe9   :  { %1373 = vmatprep.subr.bf16.mxu0 %v2471_v58  ;;  %1496 = vmatprep.subr.bf16.mxu1 %v2474_v59 }
  0xec   :  { %1374 = vmatpush1.bf16.msra.mxu0 %v2469_v60  ;;  %1497 = vmatpush1.bf16.msra.mxu1 %v2472_v61 }
  0xed   :  { %1375 = vmatprep.subr.bf16.mxu0 %v2477_v62  ;;  %1498 = vmatprep.subr.bf16.mxu1 %v2480_v63 }
  0xf0   :  { %1376 = vmatpush1.bf16.msra.mxu0 %v2475_v0  ;;  %1499 = vmatpush1.bf16.msra.mxu1 %v2478_v1 }
  0xf1   :  { %1377 = vmatprep.subr.bf16.mxu0 %v2483_v2  ;;  %1500 = vmatprep.subr.bf16.mxu1 %v2486_v3 }
  0xf4   :  { %1378 = vmatpush1.bf16.msra.mxu0 %v2481_v4  ;;  %1501 = vmatpush1.bf16.msra.mxu1 %v2484_v5 }
  0xf5   :  { %1379 = vmatprep.subr.bf16.mxu0 %v2489_v6  ;;  %1502 = vmatprep.subr.bf16.mxu1 %v2492_v7 }
  0xf8   :  { %1380 = vmatpush1.bf16.msra.mxu0 %v2487_v9  ;;  %1503 = vmatpush1.bf16.msra.mxu1 %v2490_v10 }
  0xf9   :  { %2122 = vmatprep.subr.bf16.mxu0 %v2496_v11  ;;  %2144 = vmatprep.subr.bf16.mxu1 %v2497_v12  ;;  %v2631_v11 = vmov 1983009808  }
  0xfa   :  { %v1867_v12 = vunpack.c.l.s4 %v2631_v11 }
  0xfb   :  { %1382 = vmatmul.mubr.bf16.vlgmr.msra.gmra.mrb[0].mxu0 %v91_v13  ;;  %1505 = vmatmul.mubr.bf16.vlgmr.msra.gmra.mrb[0].mxu1 %v91_v13 }
  0xfc   :  { %2123 = vmatpush3.bf16.msra.mxu0 %v2498_v14  ;;  %2145 = vmatpush3.bf16.msra.mxu1 %v2499_v15  ;;  %v2088_v15 = vld [vmem:[%s2723_s4] ss:$0 sm:$0xff] }
  0xfd   :  { %2124 = vmatprep.subr.bf16.mxu0 %v2500_v16  ;;  %2146 = vmatprep.subr.bf16.mxu1 %v2501_v17 }
 0x100   :  { %2125 = vmatpush3.bf16.msra.mxu0 %v2502_v18  ;;  %2147 = vmatpush3.bf16.msra.mxu1 %v2503_v19 }
 0x101   :  { %2126 = vmatprep.subr.bf16.mxu0 %v2504_v20  ;;  %2148 = vmatprep.subr.bf16.mxu1 %v2505_v21  ;;  %v1868_v20 = vunpack.c.0.s8 %v1867_v12 }
 0x104   :  { %2127 = vmatpush3.bf16.msra.mxu0 %v2506_v22  ;;  %2149 = vmatpush3.bf16.msra.mxu1 %v2507_v23 }
 0x105   :  { %2128 = vmatprep.subr.bf16.mxu0 %v2508_v24  ;;  %2150 = vmatprep.subr.bf16.mxu1 %v2509_v25 }
 0x108   :  { %2129 = vmatpush3.bf16.msra.mxu0 %v2510_v26  ;;  %2151 = vmatpush3.bf16.msra.mxu1 %v2511_v27  ;;  %v1871_v27 = vsub.s32 %v1868_v20, %v288_v45 }
 0x109   :  { %2130 = vmatprep.subr.bf16.mxu0 %v2512_v28  ;;  %2152 = vmatprep.subr.bf16.mxu1 %v2513_v29 }
 0x10c   :  { %2131 = vmatpush3.bf16.msra.mxu0 %v2514_v30  ;;  %2153 = vmatpush3.bf16.msra.mxu1 %v2515_v31 }
 0x10d   :  { %2132 = vmatprep.subr.bf16.mxu0 %v2516_v32  ;;  %2154 = vmatprep.subr.bf16.mxu1 %v2517_v33 }
 0x110   :  { %2133 = vmatpush3.bf16.msra.mxu0 %v2518_v34  ;;  %2155 = vmatpush3.bf16.msra.mxu1 %v2519_v35 }
 0x111   :  { %2134 = vmatprep.subr.bf16.mxu0 %v2520_v36  ;;  %2156 = vmatprep.subr.bf16.mxu1 %v2521_v37 }
 0x114   :  { %2135 = vmatpush3.bf16.msra.mxu0 %v2522_v38  ;;  %2157 = vmatpush3.bf16.msra.mxu1 %v2523_v39 }
 0x115   :  { %2136 = vmatprep.subr.bf16.mxu0 %v2524_v40  ;;  %2158 = vmatprep.subr.bf16.mxu1 %v2525_v41 }
 0x118   :  { %2137 = vmatpush3.bf16.msra.mxu0 %v2526_v42  ;;  %2159 = vmatpush3.bf16.msra.mxu1 %v2527_v43 }
 0x1ce   :  { %v1383_v55 = vpop.f32.mrb[0].mxu0  ;;  %v1506_v56 = vpop.f32.mrb[0].mxu1 }
 0x1cf   :  { %v2166_v57 = vadd.f32 %v1383_v55, %v290_v51  ;;  %v2168_v58 = vadd.f32 %v1506_v56, %v298_v52  ;;  %v1385_v59 = vpop.f32.mrb[1].mxu0  ;;  %v1508_v60 = vpop.f32.mrb[1].mxu1 }
 0x1d0   :  { %v2167_v61 = vadd.f32 %v1385_v59, %v294_v53  ;;  %v2169_v62 = vadd.f32 %v1508_v60, %v302_v54  ;;  %v1387_v63 = vpop.f32.mrb[2].mxu0  ;;  %v1510_v0 = vpop.f32.mrb[2].mxu1 }
 0x1d1   :  { %v1513_v1 = vmax.f32 %v2166_v57, 0.0  ;;  %v1515_v2 = vmax.f32 %v2168_v58, 0.0  ;;  %v1388_v3 = vpop.f32.mrb[3].mxu0  ;;  %v1511_v4 = vpop.f32.mrb[3].mxu1 }
 0x1d2   :  { %v1514_v5 = vmax.f32 %v2167_v61, 0.0  ;;  %v1516_v6 = vmax.f32 %v2169_v62, 0.0 }
 0x1d3   :  { %v1517_v9 = vpack.c.bf16 %v1513_v1, %v1513_v1  ;;  %v1519_v10 = vpack.c.bf16 %v1515_v2, %v1515_v2 }
 0x1d4   :  { %v1518_v7 = vpack.c.bf16 %v1514_v5, %v1514_v5  ;;  %v1520_v8 = vpack.c.bf16 %v1516_v6, %v1516_v6 }
 0x1d6   :  { %1816 = vmatprep.mubr.bf16.mxu0 %v1518_v7  ;;  %1856 = vmatprep.mubr.bf16.mxu1 %v1520_v8 }
 0x1d7   :  { %1817 = vmatmul.mubr.bf16.vlgmr.msra.gmra.mrb[4].mxu0 %v1517_v9  ;;  %1857 = vmatmul.mubr.bf16.vlgmr.msra.gmra.mrb[4].mxu1 %v1519_v10 }
 0x2aa   :  { %v2138_v13 = vpop.f32.mrb[4].mxu0  ;;  %v2160_v14 = vpop.f32.mrb[4].mxu1 }
 0x2ab   :  { %v2139_v16 = vpop.f32.mrb[5].mxu0  ;;  %v2161_v17 = vpop.f32.mrb[5].mxu1 }
 0x2ac   :  { %v2140_v18 = vadd.f32 %v2139_v16, %v2138_v13  ;;  %v2162_v19 = vadd.f32 %v2161_v17, %v2160_v14  ;;  %v2141_v21 = vpop.f32.mrb[6].mxu0  ;;  %v2163_v22 = vpop.f32.mrb[6].mxu1 }
 0x2ad   :  { %v2142_v23 = vpop.f32.mrb[7].mxu0  ;;  %v2164_v24 = vpop.f32.mrb[7].mxu1 }
 0x2ae   :  { %v1819_v25 = vadd.f32 %v2140_v18, %v2088_v15 }
 0x2b0   :  { %v1859_v26 = vadd.f32 %v2162_v19, %v1819_v25 }
 0x2b2   :  { %v1864_v28 = vpack.c.bf16 %v1859_v26, %v1859_v26 }
 0x2b4   :  { %v1872_v29 = vrot.slane %v1864_v28, %v1871_v27  ;;  %2121 = vst.sshfl [vmem:[#allocation8] sm:$0x3 pattern:$0x76325410] %v1864_v28 }
 0x2b6   :  { %v1873_v30 = vcombine.high %v1872_v29, %v1872_v29 }
 0x2b8   :  { %1877 = vst [vmem:[#allocation8 + $0x2] sm:$0x3] %v1873_v30 }
 0x2b9   :  { %1882 = vsyncadd [#allocation4], 32  ;;  %s2632_s11 = smov [#allocation8]  }
 0x2ba   :  { %s1883_s4 = sshll.u32 %s2632_s11, 4  ;;  %s1884_s4 = int_to_ptr.vmem [resolvable:$true] %s1883_s4 }
 0x2bb   :  { %s2594_s12 = scalar_lea.vmem %s1884_s4, 32  ;;  %s2598_s13 = scalar_lea.vmem %s1884_s4, 64 }
 0x2bc   :  { %p2595_p10 = scmp.ne.s32.totalorder %s1884_s4, %s2594_s12  ;;  %p2599_p11 = scmp.lt.s32.totalorder %s1884_s4, %s1884_s4 }
 0x2bd   :  { %p2600_p12 = scmp.lt.s32.totalorder %s2598_s13, %s2594_s12 }
 0x2bf   :  { %p2601_p13 = por %p2600_p12, %p2599_p11 }
 0x2c1   :  { %p2602_p0 = pnand %p2601_p13, %p2595_p10 }
 0x2c3   :  { %2605 = shalt.err (!%p2602_p0)
}
 0x2c4   :  { %s2606_s16 = scalar_lea.hbm %s2724_s5, 32 }
 0x2c5   :  { %p2607_p1 = scmp.ne.s32.totalorder %s2724_s5, %s2606_s16  ;;  %p2610_p2 = scmp.lt.u32.totalorder %s2606_s16, %s2724_s5 }
 0x2c7   :  { %p2612_p3 = pnand %p2610_p2, %p2607_p1 }
 0x2c9   :  { %2615 = shalt.err (!%p2612_p3)
}
 0x2ca   :  { %s2633_s20 = smov 32   ;;  %s2634_s21 = smov 2  }
 0x2cb   :  { %1889 = dma.vmem_to_hbm [thread:$0]  %s1884_s4, 32, %s2724_s5, [#allocation4], %s2633_s20, %s2633_s20, %s2634_s21  }
 0x2cc   :  { %2620 = dma.done.wait [#allocation4], 64  }
 0x2cd   :  { %2621 = vsyncadd [#allocation4], 4294967232 }
 0x2ce   :  { %1893 = vsyncpa [#allocation3], 1 }
 0x2cf   :  { %1894 = vsyncpa [#allocation6], 1 }
 0x2d0   :  { %1895 = vsyncpa [#allocation4], 1 }

</bundles_post_ra>
